<compile_context>
chip_gen: v7x
topology: tpu7x:2x2x1
jax: 0.10.0
libtpu: 0.0.40
codegen_flags: <defaults>
</compile_context>

<pallas_src>
import functools

import jax
import jax.numpy as jnp
from jax.experimental import pallas as pl
from jax.experimental.pallas import tpu as pltpu

_LANE = 128


def _round_up(x, m):
    return ((x + m - 1) // m) * m


def _node_update_kernel(*refs, use_norm, use_act, concat, out_pad, norm_after):
    """Fused: (optional norm scale) -> matmul + bias -> (optional relu / concat)."""
    if use_norm:
        h_ref, norm_ref, wt_ref, b_ref, out_ref = refs
    else:
        h_ref, wt_ref, b_ref, out_ref = refs
        norm_ref = None

    h = h_ref[...]                                      # (tile_n, in_feats), native dtype
    if use_norm and not norm_after:
        h = h * norm_ref[...]                           # (tile_n, 1) broadcast, pre-matmul

    # MXU matmul in the input dtype, f32 accumulate (no explicit up-casts).
    y = jnp.dot(h, wt_ref[...], preferred_element_type=jnp.float32)   # (tile_n, out_pad) f32

    if use_norm and norm_after:
        y = y * norm_ref[...]                           # row scale commutes with the matmul
    y = y + b_ref[...]                                  # bias after any scaling (f32)

    if concat:
        # Two direct static slice stores (lane-dense halves) -- no concatenate.
        out_ref[:, :out_pad] = y.astype(out_ref.dtype)
        out_ref[:, out_pad:] = jnp.maximum(y, 0.0).astype(out_ref.dtype)
    elif use_act:
        out_ref[...] = jnp.maximum(y, 0.0).astype(out_ref.dtype)
    else:
        out_ref[...] = y.astype(out_ref.dtype)


def prepare_params(w, b, lane=_LANE):
    """One-time parameter prep (call OUTSIDE the per-step hot loop).

    W [out, in], b [out]  ->  W^T padded to [in, out_pad], b padded to [1, out_pad],
    where out_pad = round_up(out, 128) so the kernel output is lane-dense.
    Padded columns are zero, so padded outputs are exactly 0 (and relu(0)=0).
    """
    out_feats, in_feats = w.shape
    out_pad = _round_up(out_feats, lane)
    wt_pad = jnp.pad(w.T, ((0, 0), (0, out_pad - out_feats)))
    b_pad = jnp.pad(b.reshape(1, out_feats), ((0, 0), (0, out_pad - out_feats)))
    return wt_pad, b_pad, out_feats


def _pick_tile_n(n, in_feats, out_cols_pad, itemsize, tile_n_hint):
    """Row tile: large (fewer grid steps) but bounded so double-buffered
    activations stay ~12 MiB of VMEM. Multiple of 16 (covers bf16 packing)."""
    if tile_n_hint is not None:
        tile = int(tile_n_hint)
    else:
        budget = 12 << 20                                  # bytes for 2x(in + out) buffers
        per_row = 2 * (in_feats + 1 + out_cols_pad) * itemsize
        tile = budget // max(per_row, 1)
        tile = max(256, min(tile, 2048))
    tile = min(tile, _round_up(n, 16))
    return max(16, _round_up(tile, 16))


def node_update(h, norm, wt_pad, b_pad, out_feats, *, activation=False,
                test=False, concat=False, tile_n=None):
    """Pallas wrapper.

    h: [N, in_feats], norm: [N] (only used when test=True; may be None otherwise),
    wt_pad/b_pad from prepare_params.
    Returns [N, out_feats] (or [N, 2*out_feats] when concat).
    """
    n, in_feats = h.shape
    in_feats_w, out_pad = wt_pad.shape
    assert in_feats_w == in_feats, "weight/in_feats mismatch"
    out_cols_pad = 2 * out_pad if concat else out_pad

    itemsize = jnp.dtype(h.dtype).itemsize
    tile_rows = _pick_tile_n(n, in_feats, out_cols_pad, itemsize, tile_n)

    use_norm = bool(test)
    # Apply the norm on whichever side of the matmul touches fewer lanes.
    norm_after = use_norm and (out_pad < in_feats)

    kernel = functools.partial(_node_update_kernel, use_norm=use_norm,
                               use_act=bool(activation), concat=bool(concat),
                               out_pad=out_pad, norm_after=norm_after)

    in_arrays = [h]
    in_specs = [pl.BlockSpec((tile_rows, in_feats), lambda i: (i, 0))]
    if use_norm:
        in_arrays.append(norm.reshape(n, 1))
        in_specs.append(pl.BlockSpec((tile_rows, 1), lambda i: (i, 0)))
    in_arrays += [wt_pad, b_pad]
    in_specs += [pl.BlockSpec((in_feats, out_pad), lambda i: (0, 0)),
                 pl.BlockSpec((1, out_pad), lambda i: (0, 0))]

    w_itemsize = jnp.dtype(wt_pad.dtype).itemsize
    vmem_need = (2 * tile_rows * (in_feats + 1) * itemsize       # double-buffered h (+ norm)
                 + (in_feats + 1) * out_pad * w_itemsize         # resident W^T + bias
                 + 2 * tile_rows * out_cols_pad * itemsize)      # double-buffered output
    vmem_limit = int(min(max(2 * vmem_need, 32 << 20), 48 << 20))

    out_raw = pl.pallas_call(
        kernel,
        out_shape=jax.ShapeDtypeStruct((n, out_cols_pad), h.dtype),
        grid_spec=pltpu.PrefetchScalarGridSpec(
            num_scalar_prefetch=0,
            grid=(pl.cdiv(n, tile_rows),),
            in_specs=in_specs,
            out_specs=pl.BlockSpec((tile_rows, out_cols_pad), lambda i: (i, 0)),
        ),
        compiler_params=pltpu.CompilerParams(
            dimension_semantics=("parallel",),
            vmem_limit_bytes=vmem_limit),
    )(*in_arrays)

    # Strip lane padding (layout plumbing only; no-op when out_feats % 128 == 0).
    if out_pad == out_feats:
        return out_raw
    if concat:
        return jnp.concatenate(
            [out_raw[:, :out_feats], out_raw[:, out_pad:out_pad + out_feats]], axis=1)
    return out_raw[:, :out_feats]


def node_update_ref(h, norm, w, b, *, activation=False, test=False, concat=False):
    """Pure-JAX reference mirroring the PyTorch forward."""
    x = h * norm.reshape(-1, 1) if test else h
    y = x @ w.T + b
    if concat:
        return jnp.concatenate([y, jax.nn.relu(y)], axis=1)
    if activation:
        return jax.nn.relu(y)
    return y


if __name__ == "__main__":
    # Small, deterministic synthetic setup (no checkpoint / dataset load).
    # TODO(synk): DGL RedditDataset loading / graph message passing is out of scope;
    # only the dense per-node update (norm-scale -> Linear -> act/concat) is kernelized.
    N, IN_FEATS, OUT_FEATS = 128, 64, 32
    key = jax.random.PRNGKey(0)
    k_h, k_norm, k_w, k_b = jax.random.split(key, 4)

    h = jax.random.normal(k_h, (N, IN_FEATS), dtype=jnp.float32)
    norm = jax.random.uniform(k_norm, (N,), dtype=jnp.float32) + 0.5

    # nn.Linear(in_feats, out_feats) parameters: W [out,in], b [out]
    bound = 1.0 / (IN_FEATS ** 0.5)
    w = jax.random.uniform(k_w, (OUT_FEATS, IN_FEATS), dtype=jnp.float32,
                           minval=-bound, maxval=bound)
    b = jax.random.uniform(k_b, (OUT_FEATS,), dtype=jnp.float32,
                           minval=-bound, maxval=bound)

    # One-time weight prep (pre-transpose + lane padding) outside the hot path.
    wt_pad, b_pad, out_feats = prepare_params(w, b)

    # 1) Full path: test=True (norm scale), ReLU activation, concat.
    out = jax.block_until_ready(
        node_update(h, norm, wt_pad, b_pad, out_feats,
                    activation=True, test=True, concat=True))
    ref = node_update_ref(h, norm, w, b, activation=True, test=True, concat=True)
    assert out.shape == (N, 2 * OUT_FEATS)
    assert jnp.allclose(out, ref, atol=1e-5, rtol=1e-5)

    # 2) Plain activation path (no norm, no concat) -- norm input not even DMA'd.
    out2 = jax.block_until_ready(
        node_update(h, None, wt_pad, b_pad, out_feats,
                    activation=True, test=False, concat=False))
    ref2 = node_update_ref(h, norm, w, b, activation=True, test=False, concat=False)
    assert jnp.allclose(out2, ref2, atol=1e-5, rtol=1e-5)

    # 3) Lane-aligned out_feats (=128): no padding / slicing, norm pre-scale.
    k_w2, k_b2 = jax.random.split(k_b, 2)
    w2 = jax.random.uniform(k_w2, (128, IN_FEATS), dtype=jnp.float32,
                            minval=-bound, maxval=bound)
    b2 = jax.random.uniform(k_b2, (128,), dtype=jnp.float32,
                            minval=-bound, maxval=bound)
    wt2_pad, b2_pad, of2 = prepare_params(w2, b2)
    out3 = jax.block_until_ready(
        node_update(h, norm, wt2_pad, b2_pad, of2,
                    activation=False, test=True, concat=False))
    ref3 = node_update_ref(h, norm, w2, b2, activation=False, test=True, concat=False)
    assert jnp.allclose(out3, ref3, atol=1e-5, rtol=1e-5)

    # 4) Wide input (in_feats=256 > out_pad=128): exercises post-matmul norm scaling.
    k_h3, k_w3, k_b3 = jax.random.split(k_w2, 3)
    IN3, OUT3 = 256, 64
    h3 = jax.random.normal(k_h3, (N, IN3), dtype=jnp.float32)
    bound3 = 1.0 / (IN3 ** 0.5)
    w3 = jax.random.uniform(k_w3, (OUT3, IN3), dtype=jnp.float32,
                            minval=-bound3, maxval=bound3)
    b3 = jax.random.uniform(k_b3, (OUT3,), dtype=jnp.float32,
                            minval=-bound3, maxval=bound3)
    wt3_pad, b3_pad, of3 = prepare_params(w3, b3)
    out4 = jax.block_until_ready(
        node_update(h3, norm, wt3_pad, b3_pad, of3,
                    activation=True, test=True, concat=True))
    ref4 = node_update_ref(h3, norm, w3, b3, activation=True, test=True, concat=True)
    assert jnp.allclose(out4, ref4, atol=1e-5, rtol=1e-5)

    print("KERNEL_OK")
</pallas_src>

<mosaic_0001>
module attributes {stable_mosaic.version = 11 : i64} {
  func.func @_node_update_kernel(%arg0: i32, %arg1: memref<128x64xf32, #tpu.memory_space<vmem>>, %arg2: memref<128x1xf32, #tpu.memory_space<vmem>>, %arg3: memref<64x128xf32, #tpu.memory_space<vmem>>, %arg4: memref<1x128xf32, #tpu.memory_space<vmem>>, %arg5: memref<128x256xf32, #tpu.memory_space<vmem>>) attributes {dimension_semantics = [#tpu.dimension_semantics<parallel>], iteration_bounds = array<i64: 1>, scalar_prefetch = 0 : i64, scratch_operands = 0 : i64, tpu.core_type = #tpu.core_type<tc>, window_params = [{transform_indices = @transform_0, window_bounds = array<i64: 128, 64>}, {transform_indices = @transform_1, window_bounds = array<i64: 128, 1>}, {pipeline_mode = #tpu.pipeline_mode<synchronous>, transform_indices = @transform_2, window_bounds = array<i64: 64, 128>}, {pipeline_mode = #tpu.pipeline_mode<synchronous>, transform_indices = @transform_3, window_bounds = array<i64: 1, 128>}, {transform_indices = @transform_4, window_bounds = array<i64: 128, 256>}]} {
    %c0 = arith.constant 0 : index
    %c0_0 = arith.constant 0 : index
    %0 = vector.load %arg1[%c0, %c0_0] : memref<128x64xf32, #tpu.memory_space<vmem>>, vector<128x64xf32>
    %c0_1 = arith.constant 0 : index
    %c0_2 = arith.constant 0 : index
    %1 = vector.load %arg2[%c0_1, %c0_2] : memref<128x1xf32, #tpu.memory_space<vmem>>, vector<128x1xf32>
    %2 = vector.broadcast %1 : vector<128x1xf32> to vector<128x64xf32>
    %3 = arith.mulf %0, %2 : vector<128x64xf32>
    %c0_3 = arith.constant 0 : index
    %c0_4 = arith.constant 0 : index
    %4 = vector.load %arg3[%c0_3, %c0_4] : memref<64x128xf32, #tpu.memory_space<vmem>>, vector<64x128xf32>
    %cst = arith.constant dense<0.000000e+00> : vector<128x128xf32>
    %5 = tpu.matmul %3, %4, %cst {dimension_numbers = #tpu.dot_dimension_numbers<[1], [0], [0], [1], [0, 0, 1, 1], [], []>} : vector<128x64xf32>, vector<64x128xf32>, vector<128x128xf32> -> vector<128x128xf32>
    %c0_5 = arith.constant 0 : index
    %c0_6 = arith.constant 0 : index
    %6 = vector.load %arg4[%c0_5, %c0_6] : memref<1x128xf32, #tpu.memory_space<vmem>>, vector<1x128xf32>
    %7 = vector.broadcast %6 : vector<1x128xf32> to vector<128x128xf32>
    %8 = arith.addf %5, %7 : vector<128x128xf32>
    %c0_7 = arith.constant 0 : index
    %c0_8 = arith.constant 0 : index
    %9 = vector.load %arg5[%c0_7, %c0_8] : memref<128x256xf32, #tpu.memory_space<vmem>>, vector<128x128xf32>
    tpu.vector_store %arg5[%c0_7, %c0_8], %8 {strides = array<i32>} : memref<128x256xf32, #tpu.memory_space<vmem>>, vector<128x128xf32>,
    %cst_9 = arith.constant 0.000000e+00 : f32
    %10 = vector.broadcast %cst_9 : f32 to vector<128x128xf32>
    %11 = arith.maximumf %8, %10 : vector<128x128xf32>
    %c0_10 = arith.constant 0 : index
    %c128 = arith.constant 128 : index
    %12 = vector.load %arg5[%c0_10, %c128] : memref<128x256xf32, #tpu.memory_space<vmem>>, vector<128x128xf32>
    tpu.vector_store %arg5[%c0_10, %c128], %11 {strides = array<i32>} : memref<128x256xf32, #tpu.memory_space<vmem>>, vector<128x128xf32>,
    return
  }
  func.func @transform_0(%arg0: i32) -> (i32, i32) {
    %c0_i32 = arith.constant 0 : i32
    %c0_i32_0 = arith.constant 0 : i32
    return %arg0, %c0_i32 : i32, i32
  }
  func.func @transform_1(%arg0: i32) -> (i32, i32) {
    %c0_i32 = arith.constant 0 : i32
    %c0_i32_0 = arith.constant 0 : i32
    return %arg0, %c0_i32 : i32, i32
  }
  func.func @transform_2(%arg0: i32) -> (i32, i32) {
    %c0_i32 = arith.constant 0 : i32
    %c0_i32_0 = arith.constant 0 : i32
    %c0_i32_1 = arith.constant 0 : i32
    return %c0_i32, %c0_i32_0 : i32, i32
  }
  func.func @transform_3(%arg0: i32) -> (i32, i32) {
    %c0_i32 = arith.constant 0 : i32
    %c0_i32_0 = arith.constant 0 : i32
    %c0_i32_1 = arith.constant 0 : i32
    return %c0_i32, %c0_i32_0 : i32, i32
  }
  func.func @transform_4(%arg0: i32) -> (i32, i32) {
    %c0_i32 = arith.constant 0 : i32
    %c0_i32_0 = arith.constant 0 : i32
    return %arg0, %c0_i32 : i32, i32
  }
}

</mosaic_0001>

<bundles_post_ra>
// kernel: tpu_custom_call.1
= control target key start
LH: loop header
LB: loop body
LE: loop exit
PB: predicated region body
PF: predicated region fallthrough
CT: control target
= control target key end

     0   :  { %v554_v2 = vmov 0   ;;  %s752_s0 = inlined_call_operand.vmem [shape: f32[128,64], index: 0, kind: input, shape index: {}]   ;;  %s753_s1 = inlined_call_operand.vmem [shape: f32[128,1], index: 1, kind: input, shape index: {}]   ;;  %s754_s2 = inlined_call_operand.vmem [shape: f32[64,128], index: 2, kind: input, shape index: {}]   ;;  %s755_s3 = inlined_call_operand.vmem [shape: f32[1,128], index: 3, kind: input, shape index: {}]   ;;  %s756_s4 = inlined_call_operand.hbm [shape: f32[128,256], index: 4, kind: output, shape index: {}]  }
   0x1   :  { %v35_v0 = vld [vmem:[%s753_s1 + $0x8] sm:$0xff]  ;;  %v34_v1 = vld [vmem:[%s753_s1] sm:$0xff]  ;;  %529 = vset.pattern.permute.xlu1 %v554_v2  ;;  %528 = vset.pattern.permute.xlu0 %v554_v2  ;;  %v148_v8 = vld [vmem:[%s754_s2 + $0x10] sm:$0xff] }
   0x2   :  { %57 = vperm.xlu1 %529, %v35_v0   ;;  %52 = vperm.xlu0 %528, %v34_v1   ;;  %v43_v3 = vld [vmem:[%s753_s1 + $0x48] sm:$0xff]  ;;  %v42_v4 = vld [vmem:[%s753_s1 + $0x40] sm:$0xff]  ;;  %v149_v9 = vld [vmem:[%s754_s2 + $0x18] sm:$0xff] }
   0x3   :  { %v146_v5 = vld [vmem:[%s754_s2] sm:$0xff]  ;;  %v147_v6 = vld [vmem:[%s754_s2 + $0x8] sm:$0xff]  ;;  %v44_v10 = vld [vmem:[%s753_s1 + $0x50] sm:$0xff]  ;;  %v504_v12 = vpack.c.bf16 %v149_v9, %v148_v8 }
   0x4   :  { %v500_v7 = vpack.c.bf16 %v147_v6, %v146_v5  ;;  %v36_v11 = vld [vmem:[%s753_s1 + $0x10] sm:$0xff]  ;;  %v150_v13 = vld [vmem:[%s754_s2 + $0x20] sm:$0xff]  ;;  %v151_v14 = vld [vmem:[%s754_s2 + $0x28] sm:$0xff] }
   0x6   :  { %97 = vperm.xlu1 %529, %v43_v3   ;;  %92 = vperm.xlu0 %528, %v42_v4  }
   0x7   :  { %501 = vmatprep.subr.bf16.mxu0 %v500_v7  ;;  %516 = vmatprep.subr.bf16.mxu1 %v500_v7 }
   0x8   :  { %503 = vmatpush3.bf16.msra.mxu0 %v500_v7  ;;  %520 = vmatpush3.bf16.msra.mxu1 %v500_v7 }
   0xa   :  { %102 = vperm.xlu1 %529, %v44_v10   ;;  %62 = vperm.xlu0 %528, %v36_v11  }
   0xb   :  { %9 = vsyncpa [#allocation3], 0  ;;  %v45_v15 = vld [vmem:[%s753_s1 + $0x58] sm:$0xff]  ;;  %505 = vmatprep.subr.bf16.mxu0 %v504_v12  ;;  %517 = vmatprep.subr.bf16.mxu1 %v504_v12  ;;  %v508_v17 = vpack.c.bf16 %v151_v14, %v150_v13  ;;  %v152_v18 = vld [vmem:[%s754_s2 + $0x30] sm:$0xff]  ;;  %vm161_vm0 = vcmask 523264  }
   0xc   :  { %v37_v16 = vld [vmem:[%s753_s1 + $0x18] sm:$0xff]  ;;  %507 = vmatpush3.bf16.msra.mxu0 %v504_v12  ;;  %521 = vmatpush3.bf16.msra.mxu1 %v504_v12  ;;  %v46_v20 = vld [vmem:[%s753_s1 + $0x60] sm:$0xff]  ;;  %v47_v23 = vld [vmem:[%s753_s1 + $0x68] sm:$0xff] }
   0xd   :  { %v153_v19 = vld [vmem:[%s754_s2 + $0x38] sm:$0xff]  ;;  %v38_v21 = vld [vmem:[%s753_s1 + $0x20] sm:$0xff]  ;;  %509 = vmatprep.subr.bf16.mxu0 %v508_v17  ;;  %518 = vmatprep.subr.bf16.mxu1 %v508_v17  ;;  %v39_v24 = vld [vmem:[%s753_s1 + $0x28] sm:$0xff] }
   0xe   :  { %107 = vperm.xlu1 %529, %v45_v15   ;;  %67 = vperm.xlu0 %528, %v37_v16   ;;  %v512_v22 = vpack.c.bf16 %v153_v19, %v152_v18  ;;  %v48_v25 = vld [vmem:[%s753_s1 + $0x70] sm:$0xff]  ;;  %v49_v27 = vld [vmem:[%s753_s1 + $0x78] sm:$0xff]  ;;  %v19_v29 = vld [vmem:[%s752_s0 + $0x8] sm:$0xff] }
   0xf   :  { %v40_v26 = vld [vmem:[%s753_s1 + $0x30] sm:$0xff]  ;;  %v41_v28 = vld [vmem:[%s753_s1 + $0x38] sm:$0xff]  ;;  %v18_v30 = vld [vmem:[%s752_s0] sm:$0xff] }
  0x10   :  { %511 = vmatpush3.bf16.msra.mxu0 %v508_v17  ;;  %522 = vmatpush3.bf16.msra.mxu1 %v508_v17  ;;  %v27_v35 = vld [vmem:[%s752_s0 + $0x48] sm:$0xff]  ;;  %v26_v36 = vld [vmem:[%s752_s0 + $0x40] sm:$0xff]  ;;  %v28_v41 = vld [vmem:[%s752_s0 + $0x50] sm:$0xff] }
  0x11   :  { %513 = vmatprep.subr.bf16.mxu0 %v512_v22  ;;  %519 = vmatprep.subr.bf16.mxu1 %v512_v22  ;;  %v20_v42 = vld [vmem:[%s752_s0 + $0x10] sm:$0xff]  ;;  %v29_v47 = vld [vmem:[%s752_s0 + $0x58] sm:$0xff]  ;;  %v30_v53 = vld [vmem:[%s752_s0 + $0x60] sm:$0xff] }
  0x12   :  { %112 = vperm.xlu1 %529, %v46_v20   ;;  %72 = vperm.xlu0 %528, %v38_v21   ;;  %v21_v48 = vld [vmem:[%s752_s0 + $0x18] sm:$0xff]  ;;  %v22_v54 = vld [vmem:[%s752_s0 + $0x20] sm:$0xff]  ;;  %v31_v59 = vld [vmem:[%s752_s0 + $0x68] sm:$0xff] }
  0x13   :  { %v23_v60 = vld [vmem:[%s752_s0 + $0x28] sm:$0xff]  ;;  %v32_v1 = vld [vmem:[%s752_s0 + $0x70] sm:$0xff]  ;;  %v33_v7 = vld [vmem:[%s752_s0 + $0x78] sm:$0xff] }
  0x14   :  { %515 = vmatpush3.bf16.msra.mxu0 %v512_v22  ;;  %523 = vmatpush3.bf16.msra.mxu1 %v512_v22  ;;  %v24_v2 = vld [vmem:[%s752_s0 + $0x30] sm:$0xff]  ;;  %v25_v8 = vld [vmem:[%s752_s0 + $0x38] sm:$0xff]  ;;  %v722_v13 = vld [vmem:[%s755_s3] ss:$0 sm:$0xff]  ;;  %s555_s0 = smov [#allocation2]  }
  0x15   :  { %s408_s3 = sshll.u32 %s555_s0, 4  ;;  %s409_s3 = int_to_ptr.vmem [resolvable:$true] %s408_s3 }
  0x16   :  { %117 = vperm.xlu1 %529, %v47_v23   ;;  %77 = vperm.xlu0 %528, %v39_v24   ;;  %s530_s1 = scalar_lea.vmem %s409_s3, 4096  ;;  %p535_p1 = scmp.lt.s32.totalorder %s409_s3, %s409_s3 }
  0x17   :  { %p531_p0 = scmp.ne.s32.totalorder %s409_s3, %s530_s1  ;;  %p536_p2 = scmp.lt.s32.totalorder %s530_s1, %s530_s1 }
  0x19   :  { %p537_p3 = por %p536_p2, %p535_p1 }
  0x1a   :  { %122 = vperm.xlu1 %529, %v48_v25   ;;  %82 = vperm.xlu0 %528, %v40_v26  }
  0x1b   :  { %p538_p4 = pnand %p537_p3, %p531_p0 }
  0x1e   :  { %127 = vperm.xlu1 %529, %v49_v27   ;;  %87 = vperm.xlu0 %528, %v41_v28  }
  0x81   :  { %v58_v31 = vpop.permute.xlu1 %57  ;;  %v53_v32 = vpop.permute.xlu0 %52 }
  0x82   :  { %v131_v33 = vmul.f32 %v58_v31, %v19_v29  ;;  %v130_v34 = vmul.f32 %v53_v32, %v18_v30 }
  0x84   :  { %476 = vmatprep.mubr.msk.f32.mxu0 %vm161_vm0, %v130_v34 }
  0x85   :  { %v98_v37 = vpop.permute.xlu1 %97  ;;  %v93_v38 = vpop.permute.xlu0 %92  ;;  %477 = vmatmul.mubr.msk.f32.vlgmr.msra.gmra.mrb[0].mxu0 %vm161_vm0, %v131_v33 }
  0x86   :  { %v139_v39 = vmul.f32 %v98_v37, %v27_v35  ;;  %v138_v40 = vmul.f32 %v93_v38, %v26_v36 }
  0x88   :  { %488 = vmatprep.mubr.msk.f32.mxu1 %vm161_vm0, %v138_v40 }
  0x89   :  { %v103_v43 = vpop.permute.xlu1 %102  ;;  %v63_v44 = vpop.permute.xlu0 %62  ;;  %489 = vmatmul.mubr.msk.f32.vlgmr.msra.gmra.mrb[0].mxu1 %vm161_vm0, %v139_v39 }
  0x8a   :  { %v140_v45 = vmul.f32 %v103_v43, %v28_v41  ;;  %v132_v46 = vmul.f32 %v63_v44, %v20_v42 }
  0x8c   :  { %479 = vmatprep.mubr.msk.f32.mxu0 %vm161_vm0, %v132_v46  ;;  %491 = vmatprep.mubr.msk.f32.mxu1 %vm161_vm0, %v140_v45 }
  0x8d   :  { %v108_v49 = vpop.permute.xlu1 %107  ;;  %v68_v50 = vpop.permute.xlu0 %67 }
  0x8e   :  { %v141_v51 = vmul.f32 %v108_v49, %v29_v47  ;;  %v133_v52 = vmul.f32 %v68_v50, %v21_v48 }
  0x90   :  { %480 = vmatmul.mubr.msk.f32.gmra.mrb[2].mxu0 %vm161_vm0, %v133_v52  ;;  %492 = vmatmul.mubr.msk.f32.gmra.mrb[2].mxu1 %vm161_vm0, %v141_v51 }
  0x91   :  { %v113_v55 = vpop.permute.xlu1 %112  ;;  %v73_v56 = vpop.permute.xlu0 %72 }
  0x92   :  { %v142_v57 = vmul.f32 %v113_v55, %v30_v53  ;;  %v134_v58 = vmul.f32 %v73_v56, %v22_v54 }
  0x94   :  { %482 = vmatprep.mubr.msk.f32.mxu0 %vm161_vm0, %v134_v58  ;;  %494 = vmatprep.mubr.msk.f32.mxu1 %vm161_vm0, %v142_v57 }
  0x95   :  { %v118_v61 = vpop.permute.xlu1 %117  ;;  %v78_v62 = vpop.permute.xlu0 %77 }
  0x96   :  { %v143_v63 = vmul.f32 %v118_v61, %v31_v59  ;;  %v135_v0 = vmul.f32 %v78_v62, %v23_v60 }
  0x98   :  { %483 = vmatmul.mubr.msk.f32.gmra.mrb[4].mxu0 %vm161_vm0, %v135_v0  ;;  %495 = vmatmul.mubr.msk.f32.gmra.mrb[4].mxu1 %vm161_vm0, %v143_v63 }
  0x99   :  { %v123_v3 = vpop.permute.xlu1 %122  ;;  %v83_v4 = vpop.permute.xlu0 %82 }
  0x9a   :  { %v144_v5 = vmul.f32 %v123_v3, %v32_v1  ;;  %v136_v6 = vmul.f32 %v83_v4, %v24_v2 }
  0x9c   :  { %485 = vmatprep.mubr.msk.f32.mxu0 %vm161_vm0, %v136_v6  ;;  %497 = vmatprep.mubr.msk.f32.mxu1 %vm161_vm0, %v144_v5 }
  0x9d   :  { %v128_v9 = vpop.permute.xlu1 %127  ;;  %v88_v10 = vpop.permute.xlu0 %87 }
  0x9e   :  { %v145_v11 = vmul.f32 %v128_v9, %v33_v7  ;;  %v137_v12 = vmul.f32 %v88_v10, %v25_v8 }
  0xa0   :  { %486 = vmatmul.mubr.msk.f32.gmra.mrb[6].mxu0 %vm161_vm0, %v137_v12  ;;  %498 = vmatmul.mubr.msk.f32.gmra.mrb[6].mxu1 %vm161_vm0, %v145_v11 }
 0x158   :  { %v478_v14 = vpop.f32.mrb[0].mxu0 }
 0x159   :  { %v282_v15 = vadd.f32 %v478_v14, %v722_v13  ;;  %v276_v16 = vpop.f32.mrb[1].mxu0 }
 0x15a   :  { %v277_v17 = vadd.f32 %v722_v13, %v276_v16 }
 0x15b   :  { %356 = vst [vmem:[#allocation2 + $0x10] sm:$0xff] %v282_v15  ;;  %v372_v18 = vmax.f32 %v282_v15, 0.0 }
 0x15c   :  { %355 = vst [vmem:[#allocation2] sm:$0xff] %v277_v17  ;;  %v371_v19 = vmax.f32 %v277_v17, 0.0  ;;  %v490_v20 = vpop.f32.mrb[0].mxu1 }
 0x15d   :  { %388 = vst [vmem:[#allocation2 + $0x18] sm:$0xff] %v372_v18  ;;  %v322_v21 = vadd.f32 %v490_v20, %v722_v13  ;;  %v316_v22 = vpop.f32.mrb[1].mxu1 }
 0x15e   :  { %387 = vst [vmem:[#allocation2 + $0x8] sm:$0xff] %v371_v19  ;;  %v317_v23 = vadd.f32 %v722_v13, %v316_v22 }
 0x15f   :  { %364 = vst [vmem:[#allocation2 + $0x90] sm:$0xff] %v322_v21  ;;  %v380_v24 = vmax.f32 %v322_v21, 0.0 }
 0x160   :  { %363 = vst [vmem:[#allocation2 + $0x80] sm:$0xff] %v317_v23  ;;  %v379_v25 = vmax.f32 %v317_v23, 0.0 }
 0x161   :  { %396 = vst [vmem:[#allocation2 + $0x98] sm:$0xff] %v380_v24 }
 0x162   :  { %395 = vst [vmem:[#allocation2 + $0x88] sm:$0xff] %v379_v25 }
 0x163   :  { %v481_v26 = vpop.f32.mrb[2].mxu0  ;;  %v493_v27 = vpop.f32.mrb[2].mxu1 }
 0x164   :  { %v292_v28 = vadd.f32 %v481_v26, %v722_v13  ;;  %v332_v29 = vadd.f32 %v493_v27, %v722_v13  ;;  %v286_v30 = vpop.f32.mrb[3].mxu0  ;;  %v326_v31 = vpop.f32.mrb[3].mxu1 }
 0x165   :  { %v287_v32 = vadd.f32 %v722_v13, %v286_v30  ;;  %v327_v33 = vadd.f32 %v722_v13, %v326_v31 }
 0x166   :  { %358 = vst [vmem:[#allocation2 + $0x30] sm:$0xff] %v292_v28  ;;  %v374_v34 = vmax.f32 %v292_v28, 0.0  ;;  %366 = vst [vmem:[#allocation2 + $0xb0] sm:$0xff] %v332_v29  ;;  %v382_v35 = vmax.f32 %v332_v29, 0.0 }
 0x167   :  { %357 = vst [vmem:[#allocation2 + $0x20] sm:$0xff] %v287_v32  ;;  %v373_v36 = vmax.f32 %v287_v32, 0.0  ;;  %365 = vst [vmem:[#allocation2 + $0xa0] sm:$0xff] %v327_v33  ;;  %v381_v37 = vmax.f32 %v327_v33, 0.0 }
 0x168   :  { %390 = vst [vmem:[#allocation2 + $0x38] sm:$0xff] %v374_v34  ;;  %398 = vst [vmem:[#allocation2 + $0xb8] sm:$0xff] %v382_v35 }
 0x169   :  { %389 = vst [vmem:[#allocation2 + $0x28] sm:$0xff] %v373_v36  ;;  %397 = vst [vmem:[#allocation2 + $0xa8] sm:$0xff] %v381_v37 }
 0x16b   :  { %v484_v38 = vpop.f32.mrb[4].mxu0  ;;  %v496_v39 = vpop.f32.mrb[4].mxu1 }
 0x16c   :  { %v302_v40 = vadd.f32 %v484_v38, %v722_v13  ;;  %v342_v41 = vadd.f32 %v496_v39, %v722_v13  ;;  %v296_v42 = vpop.f32.mrb[5].mxu0  ;;  %v336_v43 = vpop.f32.mrb[5].mxu1 }
 0x16d   :  { %v297_v44 = vadd.f32 %v722_v13, %v296_v42  ;;  %v337_v45 = vadd.f32 %v722_v13, %v336_v43 }
 0x16e   :  { %360 = vst [vmem:[#allocation2 + $0x50] sm:$0xff] %v302_v40  ;;  %v376_v46 = vmax.f32 %v302_v40, 0.0  ;;  %368 = vst [vmem:[#allocation2 + $0xd0] sm:$0xff] %v342_v41  ;;  %v384_v47 = vmax.f32 %v342_v41, 0.0 }
 0x16f   :  { %359 = vst [vmem:[#allocation2 + $0x40] sm:$0xff] %v297_v44  ;;  %v375_v48 = vmax.f32 %v297_v44, 0.0  ;;  %367 = vst [vmem:[#allocation2 + $0xc0] sm:$0xff] %v337_v45  ;;  %v383_v49 = vmax.f32 %v337_v45, 0.0 }
 0x170   :  { %392 = vst [vmem:[#allocation2 + $0x58] sm:$0xff] %v376_v46  ;;  %400 = vst [vmem:[#allocation2 + $0xd8] sm:$0xff] %v384_v47 }
 0x171   :  { %391 = vst [vmem:[#allocation2 + $0x48] sm:$0xff] %v375_v48  ;;  %399 = vst [vmem:[#allocation2 + $0xc8] sm:$0xff] %v383_v49 }
 0x173   :  { %v487_v50 = vpop.f32.mrb[6].mxu0  ;;  %v499_v51 = vpop.f32.mrb[6].mxu1 }
 0x174   :  { %v312_v52 = vadd.f32 %v487_v50, %v722_v13  ;;  %v352_v53 = vadd.f32 %v499_v51, %v722_v13  ;;  %v306_v54 = vpop.f32.mrb[7].mxu0  ;;  %v346_v55 = vpop.f32.mrb[7].mxu1 }
 0x175   :  { %v307_v56 = vadd.f32 %v722_v13, %v306_v54  ;;  %v347_v57 = vadd.f32 %v722_v13, %v346_v55 }
 0x176   :  { %362 = vst [vmem:[#allocation2 + $0x70] sm:$0xff] %v312_v52  ;;  %v378_v58 = vmax.f32 %v312_v52, 0.0  ;;  %370 = vst [vmem:[#allocation2 + $0xf0] sm:$0xff] %v352_v53  ;;  %v386_v59 = vmax.f32 %v352_v53, 0.0 }
 0x177   :  { %361 = vst [vmem:[#allocation2 + $0x60] sm:$0xff] %v307_v56  ;;  %v377_v60 = vmax.f32 %v307_v56, 0.0  ;;  %369 = vst [vmem:[#allocation2 + $0xe0] sm:$0xff] %v347_v57  ;;  %v385_v61 = vmax.f32 %v347_v57, 0.0 }
 0x178   :  { %394 = vst [vmem:[#allocation2 + $0x78] sm:$0xff] %v378_v58  ;;  %402 = vst [vmem:[#allocation2 + $0xf8] sm:$0xff] %v386_v59 }
 0x179   :  { %393 = vst [vmem:[#allocation2 + $0x68] sm:$0xff] %v377_v60  ;;  %401 = vst [vmem:[#allocation2 + $0xe8] sm:$0xff] %v385_v61 }
 0x17a   :  { %541 = shalt.err (!%p538_p4)
}
 0x17b   :  { %s542_s18 = scalar_lea.hbm %s756_s4, 4096 }
 0x17c   :  { %p543_p5 = scmp.ne.s32.totalorder %s756_s4, %s542_s18  ;;  %p546_p6 = scmp.lt.u32.totalorder %s542_s18, %s756_s4 }
 0x17e   :  { %p548_p7 = pnand %p546_p6, %p543_p5 }
 0x180   :  { %551 = shalt.err (!%p548_p7)
}
 0x181   :  { %s556_s23 = smov 256   ;;  %s557_s24 = smov 16  }
 0x182   :  { %414 = dma.vmem_to_hbm [thread:$0]  %s409_s3, 4096, %s756_s4, [#allocation3], %s556_s23, %s556_s23, %s557_s24  }
 0x183   :  { %552 = dma.done.wait [#allocation3], 4096  }
 0x184   :  { %553 = vsyncadd [#allocation3], 4294963200 }
 0x185   :  { %418 = vsyncpa [#allocation3], 1 }

</bundles_post_ra>
